<compile_context>
chip_gen: v6e
topology: v6e:2x2x1
jax: 0.10.0
libtpu: 0.0.40
codegen_flags: <defaults>
</compile_context>

<pallas_src>
import functools
import math

import jax
import jax.numpy as jnp
from jax import lax
from jax.experimental import pallas as pl
from jax.experimental.pallas import tpu as pltpu


def _round_up(x, m):
    return ((x + m - 1) // m) * m


def _learned_mixin_kernel(penalty, n_rows, tile_n, tiles_per_split,
                          hidden_ref, logits_ref, bias_ref, labels_ref,
                          w_ref, b_ref, out_ref, acc_ref):
    split = pl.program_id(0)
    it = pl.program_id(1)

    @pl.when(it == 0)
    def _():
        acc_ref[...] = jnp.zeros_like(acc_ref)

    hidden = hidden_ref[...]                          # [T, H]  native dtype
    logits = logits_ref[...].astype(jnp.float32)      # [C, T]  (logits.float())
    bias = bias_ref[...].astype(jnp.float32)          # [C, T]
    labels = labels_ref[...]                          # [1, T]  int32
    w = w_ref[...]                                    # [1, H]  resident MXU operand
    b = b_ref[0, 0]                                   # scalar f32 from SMEM

    # factor = softplus(hidden @ W^T + b), produced lane-dense as [1, T]:
    # contract the H axis of w[1,H] against the H axis of hidden[T,H].
    lin = lax.dot_general(w, hidden, (((1,), (1,)), ((), ())),
                          preferred_element_type=jnp.float32) + b        # [1, T]
    # numerically stable softplus: max(x, 0) + log1p(exp(-|x|))
    factor = jnp.maximum(lin, 0.0) + jnp.log1p(jnp.exp(-jnp.abs(lin)))   # [1, T]

    # logits_log = log_softmax(logits) over classes (sublane axis 0).
    lmax = jnp.max(logits, axis=0, keepdims=True)
    lsh = logits - lmax
    logits_log = lsh - jnp.log(jnp.sum(jnp.exp(lsh), axis=0, keepdims=True))

    # bias_log = log(bias) * factor ; bias_lp = softmax(bias_log, classes)
    bias_log = jnp.log(bias) * factor                                    # [C, T]
    bmax = jnp.max(bias_log, axis=0, keepdims=True)
    bexp = jnp.exp(bias_log - bmax)
    bias_lp = bexp / jnp.sum(bexp, axis=0, keepdims=True)

    # "entropy" exactly as the reference writes it: -(exp(p) * p).sum(classes)
    ent = -jnp.sum(jnp.exp(bias_lp) * bias_lp, axis=0, keepdims=True)    # [1, T]

    # cross_entropy(logits_log + bias_log, labels): log_softmax + NLL at label.
    comb = logits_log + bias_log
    cmax = jnp.max(comb, axis=0, keepdims=True)
    csh = comb - cmax
    log_probs = csh - jnp.log(jnp.sum(jnp.exp(csh), axis=0, keepdims=True))
    classes = lax.broadcasted_iota(jnp.int32, log_probs.shape, 0)        # [C, T]
    onehot = (classes == labels).astype(jnp.float32)                     # [C, T]
    ce = -jnp.sum(onehot * log_probs, axis=0, keepdims=True)             # [1, T]

    # Mask columns beyond the true N (padding of the last partial tile).
    col0 = (split * tiles_per_split + it) * tile_n
    cols = col0 + lax.broadcasted_iota(jnp.int32, ce.shape, 1)
    valid = (cols < n_rows).astype(jnp.float32)

    per = (ce + penalty * ent) * valid                                   # [1, T]
    acc_ref[...] += jnp.sum(per, axis=1, keepdims=True)                  # [1, 1]

    @pl.when(it == pl.num_programs(1) - 1)
    def _():
        out_ref[...] = acc_ref[...]


def learned_mixin_baseline_loss(num_labels, hidden, logits, bias, teacher_probs,
                                labels, w, b, penalty, *, tile_n=2048,
                                num_splits=2):
    """Forward of LearnedMixinBaseline.

    hidden: [B, S, 768] (f32 or bf16), logits/bias: [B, S, num_labels],
    labels: [B, S] int.  teacher_probs is unused (as in the PyTorch module).
    Returns scalar f32 loss.
    """
    del teacher_probs  # unused in the reference module
    B, S, H = hidden.shape
    C = num_labels
    N = B * S

    # Column tiling: tile_n must be a multiple of 128 (lane dim of the [C, T]
    # blocks) which also satisfies the 8-sublane rule for the [T, H] block.
    tile_n = max(128, min(_round_up(tile_n, 128), _round_up(N, 128)))
    n_tiles = -(-N // tile_n)
    num_splits = max(1, num_splits)
    # Only keep >1 split (one row-range per TensorCore on v7x) when each split
    # gets a deep enough pipeline; otherwise it is just serial overhead.
    while num_splits > 1 and n_tiles < 2 * num_splits:
        num_splits = max(1, num_splits // 2)
    tiles_per_split = -(-n_tiles // num_splits)
    n_total = num_splits * tiles_per_split * tile_n
    pad = n_total - N

    # Lane-dense layouts: class-dim arrays as [C, N], labels as [1, N].
    hidden2 = hidden.reshape(N, H)                       # keep native dtype
    logits2 = jnp.transpose(logits.reshape(N, C))        # [C, N]
    bias2 = jnp.transpose(bias.reshape(N, C))            # [C, N]
    labels2 = labels.reshape(1, N).astype(jnp.int32)     # [1, N]
    if pad:
        hidden2 = jnp.pad(hidden2, ((0, pad), (0, 0)))
        logits2 = jnp.pad(logits2, ((0, 0), (0, pad)))
        bias2 = jnp.pad(bias2, ((0, 0), (0, pad)), constant_values=1.0)  # log(1)=0
        labels2 = jnp.pad(labels2, ((0, 0), (0, pad)))

    w2 = w.reshape(1, H).astype(hidden.dtype)            # MXU operand, resident
    b2 = b.reshape(1, 1).astype(jnp.float32)             # scalar -> SMEM

    row_map = lambda c, i: (c * tiles_per_split + i, 0)
    col_map = lambda c, i: (0, c * tiles_per_split + i)
    const_map = lambda c, i: (0, 0)

    # VMEM budget: hidden double-buffer dominates; small streams are sublane-
    # padded [8, tile_n] blocks.  Clamp to [32 MiB, 64 MiB] (v7x physical cap).
    itemsize = jnp.dtype(hidden.dtype).itemsize
    vmem_needed = (2 * tile_n * H * itemsize
                   + 2 * 3 * 8 * tile_n * 4
                   + (8 << 20))
    vmem_limit = int(min(64 << 20, max(32 << 20, vmem_needed)))

    kernel = functools.partial(_learned_mixin_kernel, float(penalty), N,
                               tile_n, tiles_per_split)
    partials = pl.pallas_call(
        kernel,
        out_shape=jax.ShapeDtypeStruct((num_splits, 1, 1), jnp.float32),
        grid_spec=pltpu.PrefetchScalarGridSpec(
            num_scalar_prefetch=0,
            grid=(num_splits, tiles_per_split),
            in_specs=[
                pl.BlockSpec((tile_n, H), row_map),               # hidden  [T, H]
                pl.BlockSpec((C, tile_n), col_map),               # logits  [C, T]
                pl.BlockSpec((C, tile_n), col_map),               # bias    [C, T]
                pl.BlockSpec((1, tile_n), col_map),               # labels  [1, T]
                pl.BlockSpec((1, H), const_map),                  # W, resident
                pl.BlockSpec(memory_space=pltpu.MemorySpace.SMEM),  # b scalar
            ],
            out_specs=pl.BlockSpec((None, 1, 1), lambda c, i: (c, 0, 0)),
            scratch_shapes=[pltpu.VMEM((1, 1), jnp.float32)],
        ),
        compiler_params=pltpu.CompilerParams(
            dimension_semantics=("parallel", "arbitrary"),
            vmem_limit_bytes=vmem_limit,
        ),
    )(hidden2, logits2, bias2, labels2, w2, b2)

    # loss = mean(ce) + penalty * mean(entropy) == mean(ce + penalty*entropy)
    return jnp.sum(partials) / float(N)


def _reference_loss(num_labels, hidden, logits, bias, labels, w, b, penalty):
    """Pure-JAX transcription of the PyTorch forward, for correctness checking."""
    logits = logits.astype(jnp.float32)
    logits_log = jax.nn.log_softmax(logits, axis=2)
    factor = hidden.astype(jnp.float32) @ w.reshape(-1, 1).astype(jnp.float32)
    factor = jax.nn.softplus(factor + b.reshape(1, 1).astype(jnp.float32))
    bias_log = jnp.log(bias.astype(jnp.float32)) * factor
    bias_lp = jax.nn.softmax(bias_log, axis=2)
    entropy = -(jnp.exp(bias_lp) * bias_lp).sum(2).mean(1)          # [B]
    comb = (logits_log + bias_log).reshape(-1, num_labels)
    lp = jax.nn.log_softmax(comb, axis=-1)
    ce = -jnp.take_along_axis(lp, labels.reshape(-1)[:, None], axis=-1).mean()
    return (ce + penalty * entropy).mean()


if __name__ == "__main__":
    H = 768                      # fixed by nn.Linear(768, 1)
    C = 4
    penalty = 0.03
    key = jax.random.PRNGKey(0)

    def make_inputs(k, batch, seq):
        k1, k2, k3, k4, k5, k6 = jax.random.split(k, 6)
        hidden = jax.random.normal(k1, (batch, seq, H), jnp.float32)
        logits = jax.random.normal(k2, (batch, seq, C), jnp.float32)
        # bias is exponentiated via log() in the module; keep strictly positive.
        bias = jax.nn.softmax(jax.random.normal(k3, (batch, seq, C), jnp.float32), axis=-1)
        labels = jax.random.randint(k4, (batch, seq), 0, C, dtype=jnp.int32)
        bound = 1.0 / math.sqrt(H)
        w = jax.random.uniform(k5, (1, H), jnp.float32, -bound, bound)
        b = jax.random.uniform(k6, (1,), jnp.float32, -bound, bound)
        return hidden, logits, bias, labels, w, b

    kA, kB = jax.random.split(key)

    # Config A: tiny problem -> single tile, single split, heavy tail masking.
    hidden, logits, bias, labels, w, b = make_inputs(kA, 2, 8)
    loss = learned_mixin_baseline_loss(C, hidden, logits, bias, None, labels,
                                       w, b, penalty)
    loss = jax.block_until_ready(loss)
    ref = _reference_loss(C, hidden, logits, bias, labels, w, b, penalty)
    assert jnp.allclose(loss, ref, atol=1e-4, rtol=1e-4), (float(loss), float(ref))

    # Config B: exercises the column grid (10 tiles of 128), the 2-way parallel
    # split, and partial-tile masking (N = 1200 pads to 1280).
    hidden, logits, bias, labels, w, b = make_inputs(kB, 4, 300)
    loss = learned_mixin_baseline_loss(C, hidden, logits, bias, None, labels,
                                       w, b, penalty, tile_n=128, num_splits=2)
    loss = jax.block_until_ready(loss)
    ref = _reference_loss(C, hidden, logits, bias, labels, w, b, penalty)
    assert jnp.allclose(loss, ref, atol=1e-4, rtol=1e-4), (float(loss), float(ref))

    # Config C: bf16 hidden stream (halves the dominant HBM traffic); the
    # kernel streams hidden in its native dtype and accumulates in f32.
    hidden_bf = hidden.astype(jnp.bfloat16)
    loss = learned_mixin_baseline_loss(C, hidden_bf, logits, bias, None, labels,
                                       w, b, penalty, tile_n=128, num_splits=2)
    loss = jax.block_until_ready(loss)
    ref = _reference_loss(C, hidden_bf, logits, bias, labels, w, b, penalty)
    assert jnp.allclose(loss, ref, atol=3e-2, rtol=3e-2), (float(loss), float(ref))

    print("KERNEL_OK")
</pallas_src>

<mosaic_0001>
module attributes {stable_mosaic.version = 11 : i64} {
  func.func @_learned_mixin_kernel(%arg0: i32, %arg1: i32, %arg2: memref<128x768xf32, #tpu.memory_space<vmem>>, %arg3: memref<4x128xf32, #tpu.memory_space<vmem>>, %arg4: memref<4x128xf32, #tpu.memory_space<vmem>>, %arg5: memref<1x128xi32, #tpu.memory_space<vmem>>, %arg6: memref<1x768xf32, #tpu.memory_space<vmem>>, %arg7: memref<1x1xf32, #tpu.memory_space<smem>>, %arg8: memref<1x1x1xf32, #tpu.memory_space<vmem>>, %arg9: memref<1x1xf32, #tpu.memory_space<vmem>>) attributes {dimension_semantics = [#tpu.dimension_semantics<parallel>, #tpu.dimension_semantics<arbitrary>], iteration_bounds = array<i64: 1, 1>, scalar_prefetch = 0 : i64, scratch_operands = 1 : i64, tpu.core_type = #tpu.core_type<tc>, window_params = [{transform_indices = @transform_0, window_bounds = array<i64: 128, 768>}, {transform_indices = @transform_1, window_bounds = array<i64: 4, 128>}, {transform_indices = @transform_2, window_bounds = array<i64: 4, 128>}, {transform_indices = @transform_3, window_bounds = array<i64: 1, 128>}, {pipeline_mode = #tpu.pipeline_mode<synchronous>, transform_indices = @transform_4, window_bounds = array<i64: 1, 768>}, {transform_indices = @transform_5, window_bounds = array<i64: 1, 1>}, {transform_indices = @transform_6, window_bounds = array<i64: 1, 1, 1>}]} {
    %c0_i32 = arith.constant 0 : i32
    %0 = arith.cmpi eq, %arg1, %c0_i32 : i32
    %1 = arith.extui %0 : i1 to i32
    %c0_i32_0 = arith.constant 0 : i32
    %2 = arith.cmpi ne, %1, %c0_i32_0 : i32
    scf.if %2 {
      %cst_32 = arith.constant 0.000000e+00 : f32
      %91 = vector.broadcast %cst_32 : f32 to vector<1x1xf32>
      %c0_33 = arith.constant 0 : index
      %c0_34 = arith.constant 0 : index
      %92 = vector.load %arg9[%c0_33, %c0_34] : memref<1x1xf32, #tpu.memory_space<vmem>>, vector<1x1xf32>
      tpu.vector_store %arg9[%c0_33, %c0_34], %91 {strides = array<i32>} : memref<1x1xf32, #tpu.memory_space<vmem>>, vector<1x1xf32>,
    } else {
    }
    %c0 = arith.constant 0 : index
    %c0_1 = arith.constant 0 : index
    %3 = vector.load %arg2[%c0, %c0_1] : memref<128x768xf32, #tpu.memory_space<vmem>>, vector<128x768xf32>
    %c0_2 = arith.constant 0 : index
    %c0_3 = arith.constant 0 : index
    %4 = vector.load %arg3[%c0_2, %c0_3] : memref<4x128xf32, #tpu.memory_space<vmem>>, vector<4x128xf32>
    %c0_4 = arith.constant 0 : index
    %c0_5 = arith.constant 0 : index
    %5 = vector.load %arg4[%c0_4, %c0_5] : memref<4x128xf32, #tpu.memory_space<vmem>>, vector<4x128xf32>
    %c0_6 = arith.constant 0 : index
    %c0_7 = arith.constant 0 : index
    %6 = vector.load %arg5[%c0_6, %c0_7] : memref<1x128xi32, #tpu.memory_space<vmem>>, vector<1x128xi32>
    %c0_8 = arith.constant 0 : index
    %c0_9 = arith.constant 0 : index
    %7 = vector.load %arg6[%c0_8, %c0_9] : memref<1x768xf32, #tpu.memory_space<vmem>>, vector<1x768xf32>
    %c0_10 = arith.constant 0 : index
    %c0_11 = arith.constant 0 : index
    %8 = memref.load %arg7[%c0_10, %c0_11] : memref<1x1xf32, #tpu.memory_space<smem>>
    %cst = arith.constant dense<0.000000e+00> : vector<1x128xf32>
    %9 = tpu.matmul %7, %3, %cst {dimension_numbers = #tpu.dot_dimension_numbers<[1], [1], [0], [0], [0, 0, 1, 0], [], []>} : vector<1x768xf32>, vector<128x768xf32>, vector<1x128xf32> -> vector<1x128xf32>
    %10 = vector.broadcast %8 : f32 to vector<1x128xf32>
    %11 = arith.addf %9, %10 : vector<1x128xf32>
    %cst_12 = arith.constant 0.000000e+00 : f32
    %12 = vector.broadcast %cst_12 : f32 to vector<1x128xf32>
    %13 = arith.maximumf %11, %12 : vector<1x128xf32>
    %14 = math.absf %11 : vector<1x128xf32>
    %cst_13 = arith.constant 0.000000e+00 : f32
    %15 = vector.broadcast %cst_13 : f32 to vector<1x128xf32>
    %16 = arith.subf %15, %14 : vector<1x128xf32>
    %17 = math.exp %16 : vector<1x128xf32>
    %18 = math.log1p %17 : vector<1x128xf32>
    %19 = arith.addf %13, %18 : vector<1x128xf32>
    %cst_14 = arith.constant dense<0xFF800000> : vector<128xf32>
    %20 = vector.multi_reduction <maximumf>, %4, %cst_14 [0] : vector<4x128xf32> to vector<128xf32>
    %21 = vector.shape_cast %20 : vector<128xf32> to vector<1x128xf32>
    %22 = vector.broadcast %21 : vector<1x128xf32> to vector<4x128xf32>
    %23 = arith.subf %4, %22 : vector<4x128xf32>
    %24 = math.exp %23 : vector<4x128xf32>
    %cst_15 = arith.constant dense<0.000000e+00> : vector<128xf32>
    %25 = vector.multi_reduction <add>, %24, %cst_15 [0] : vector<4x128xf32> to vector<128xf32>
    %26 = vector.shape_cast %25 : vector<128xf32> to vector<1x128xf32>
    %27 = math.log %26 : vector<1x128xf32>
    %28 = vector.broadcast %27 : vector<1x128xf32> to vector<4x128xf32>
    %29 = arith.subf %23, %28 : vector<4x128xf32>
    %30 = math.log %5 : vector<4x128xf32>
    %31 = vector.broadcast %19 : vector<1x128xf32> to vector<4x128xf32>
    %32 = arith.mulf %30, %31 : vector<4x128xf32>
    %cst_16 = arith.constant dense<0xFF800000> : vector<128xf32>
    %33 = vector.multi_reduction <maximumf>, %32, %cst_16 [0] : vector<4x128xf32> to vector<128xf32>
    %34 = vector.shape_cast %33 : vector<128xf32> to vector<1x128xf32>
    %35 = vector.broadcast %34 : vector<1x128xf32> to vector<4x128xf32>
    %36 = arith.subf %32, %35 : vector<4x128xf32>
    %37 = math.exp %36 : vector<4x128xf32>
    %cst_17 = arith.constant dense<0.000000e+00> : vector<128xf32>
    %38 = vector.multi_reduction <add>, %37, %cst_17 [0] : vector<4x128xf32> to vector<128xf32>
    %39 = vector.shape_cast %38 : vector<128xf32> to vector<1x128xf32>
    %40 = vector.broadcast %39 : vector<1x128xf32> to vector<4x128xf32>
    %41 = arith.divf %37, %40 : vector<4x128xf32>
    %42 = math.exp %41 : vector<4x128xf32>
    %43 = arith.mulf %42, %41 : vector<4x128xf32>
    %cst_18 = arith.constant dense<0.000000e+00> : vector<128xf32>
    %44 = vector.multi_reduction <add>, %43, %cst_18 [0] : vector<4x128xf32> to vector<128xf32>
    %45 = vector.shape_cast %44 : vector<128xf32> to vector<1x128xf32>
    %cst_19 = arith.constant 0.000000e+00 : f32
    %46 = vector.broadcast %cst_19 : f32 to vector<1x128xf32>
    %47 = arith.subf %46, %45 : vector<1x128xf32>
    %48 = arith.addf %29, %32 : vector<4x128xf32>
    %cst_20 = arith.constant dense<0xFF800000> : vector<128xf32>
    %49 = vector.multi_reduction <maximumf>, %48, %cst_20 [0] : vector<4x128xf32> to vector<128xf32>
    %50 = vector.shape_cast %49 : vector<128xf32> to vector<1x128xf32>
    %51 = vector.broadcast %50 : vector<1x128xf32> to vector<4x128xf32>
    %52 = arith.subf %48, %51 : vector<4x128xf32>
    %53 = math.exp %52 : vector<4x128xf32>
    %cst_21 = arith.constant dense<0.000000e+00> : vector<128xf32>
    %54 = vector.multi_reduction <add>, %53, %cst_21 [0] : vector<4x128xf32> to vector<128xf32>
    %55 = vector.shape_cast %54 : vector<128xf32> to vector<1x128xf32>
    %56 = math.log %55 : vector<1x128xf32>
    %57 = vector.broadcast %56 : vector<1x128xf32> to vector<4x128xf32>
    %58 = arith.subf %52, %57 : vector<4x128xf32>
    %59 = tpu.iota {dimensions = array<i32: 0>} : vector<4x128xi32>
    %60 = vector.broadcast %6 : vector<1x128xi32> to vector<4x128xi32>
    %61 = arith.cmpi eq, %59, %60 : vector<4x128xi32>
    %62 = arith.extui %61 : vector<4x128xi1> to vector<4x128xi32>
    %63 = arith.sitofp %62 : vector<4x128xi32> to vector<4x128xf32>
    %64 = arith.mulf %63, %58 : vector<4x128xf32>
    %cst_22 = arith.constant dense<0.000000e+00> : vector<128xf32>
    %65 = vector.multi_reduction <add>, %64, %cst_22 [0] : vector<4x128xf32> to vector<128xf32>
    %66 = vector.shape_cast %65 : vector<128xf32> to vector<1x128xf32>
    %cst_23 = arith.constant 0.000000e+00 : f32
    %67 = vector.broadcast %cst_23 : f32 to vector<1x128xf32>
    %68 = arith.subf %67, %66 : vector<1x128xf32>
    %c1_i32 = arith.constant 1 : i32
    %69 = arith.muli %arg0, %c1_i32 : i32
    %70 = arith.addi %69, %arg1 : i32
    %c128_i32 = arith.constant 128 : i32
    %71 = arith.muli %70, %c128_i32 : i32
    %72 = tpu.iota {dimensions = array<i32: 1>} : vector<1x128xi32>
    %73 = vector.broadcast %71 : i32 to vector<1x128xi32>
    %74 = arith.addi %73, %72 : vector<1x128xi32>
    %c16_i32 = arith.constant 16 : i32
    %75 = vector.broadcast %c16_i32 : i32 to vector<1x128xi32>
    %76 = arith.cmpi slt, %74, %75 : vector<1x128xi32>
    %77 = arith.extui %76 : vector<1x128xi1> to vector<1x128xi32>
    %78 = arith.sitofp %77 : vector<1x128xi32> to vector<1x128xf32>
    %cst_24 = arith.constant 3.000000e-02 : f32
    %79 = vector.broadcast %cst_24 : f32 to vector<1x128xf32>
    %80 = arith.mulf %79, %47 : vector<1x128xf32>
    %81 = arith.addf %68, %80 : vector<1x128xf32>
    %82 = arith.mulf %81, %78 : vector<1x128xf32>
    %c0_25 = arith.constant 0 : index
    %c0_26 = arith.constant 0 : index
    %83 = vector.load %arg9[%c0_25, %c0_26] : memref<1x1xf32, #tpu.memory_space<vmem>>, vector<1x1xf32>
    %cst_27 = arith.constant dense<0.000000e+00> : vector<1xf32>
    %84 = vector.multi_reduction <add>, %82, %cst_27 [1] : vector<1x128xf32> to vector<1xf32>
    %85 = vector.shape_cast %84 : vector<1xf32> to vector<1x1xf32>
    %86 = arith.addf %83, %85 : vector<1x1xf32>
    %c0_28 = arith.constant 0 : index
    %c0_29 = arith.constant 0 : index
    %87 = vector.load %arg9[%c0_28, %c0_29] : memref<1x1xf32, #tpu.memory_space<vmem>>, vector<1x1xf32>
    tpu.vector_store %arg9[%c0_28, %c0_29], %86 {strides = array<i32>} : memref<1x1xf32, #tpu.memory_space<vmem>>, vector<1x1xf32>,
    %c0_i32_30 = arith.constant 0 : i32
    %88 = arith.cmpi eq, %arg1, %c0_i32_30 : i32
    %89 = arith.extui %88 : i1 to i32
    %c0_i32_31 = arith.constant 0 : i32
    %90 = arith.cmpi ne, %89, %c0_i32_31 : i32
    scf.if %90 {
      %c0_32 = arith.constant 0 : index
      %c0_33 = arith.constant 0 : index
      %91 = vector.load %arg9[%c0_32, %c0_33] : memref<1x1xf32, #tpu.memory_space<vmem>>, vector<1x1xf32>
      %c0_34 = arith.constant 0 : index
      %c0_35 = arith.constant 0 : index
      %c0_36 = arith.constant 0 : index
      %92 = vector.load %arg8[%c0_34, %c0_35, %c0_36] : memref<1x1x1xf32, #tpu.memory_space<vmem>>, vector<1x1x1xf32>
      %93 = vector.shape_cast %92 : vector<1x1x1xf32> to vector<1x1xf32>
      %94 = vector.shape_cast %91 : vector<1x1xf32> to vector<1x1x1xf32>
      tpu.vector_store %arg8[%c0_34, %c0_35, %c0_36], %94 {strides = array<i32>} : memref<1x1x1xf32, #tpu.memory_space<vmem>>, vector<1x1x1xf32>,
    } else {
    }
    return
  }
  func.func @transform_0(%arg0: i32, %arg1: i32) -> (i32, i32) {
    %c1_i32 = arith.constant 1 : i32
    %0 = arith.muli %arg0, %c1_i32 : i32
    %1 = arith.addi %0, %arg1 : i32
    %c0_i32 = arith.constant 0 : i32
    %c0_i32_0 = arith.constant 0 : i32
    return %1, %c0_i32 : i32, i32
  }
  func.func @transform_1(%arg0: i32, %arg1: i32) -> (i32, i32) {
    %c1_i32 = arith.constant 1 : i32
    %0 = arith.muli %arg0, %c1_i32 : i32
    %1 = arith.addi %0, %arg1 : i32
    %c0_i32 = arith.constant 0 : i32
    %c0_i32_0 = arith.constant 0 : i32
    return %c0_i32, %1 : i32, i32
  }
  func.func @transform_2(%arg0: i32, %arg1: i32) -> (i32, i32) {
    %c1_i32 = arith.constant 1 : i32
    %0 = arith.muli %arg0, %c1_i32 : i32
    %1 = arith.addi %0, %arg1 : i32
    %c0_i32 = arith.constant 0 : i32
    %c0_i32_0 = arith.constant 0 : i32
    return %c0_i32, %1 : i32, i32
  }
  func.func @transform_3(%arg0: i32, %arg1: i32) -> (i32, i32) {
    %c1_i32 = arith.constant 1 : i32
    %0 = arith.muli %arg0, %c1_i32 : i32
    %1 = arith.addi %0, %arg1 : i32
    %c0_i32 = arith.constant 0 : i32
    %c0_i32_0 = arith.constant 0 : i32
    return %c0_i32, %1 : i32, i32
  }
  func.func @transform_4(%arg0: i32, %arg1: i32) -> (i32, i32) {
    %c0_i32 = arith.constant 0 : i32
    %c0_i32_0 = arith.constant 0 : i32
    %c0_i32_1 = arith.constant 0 : i32
    return %c0_i32, %c0_i32_0 : i32, i32
  }
  func.func @transform_5(%arg0: i32, %arg1: i32) -> (i32, i32) {
    %c0_i32 = arith.constant 0 : i32
    %c0_i32_0 = arith.constant 0 : i32
    %c0_i32_1 = arith.constant 0 : i32
    return %c0_i32, %c0_i32_0 : i32, i32
  }
  func.func @transform_6(%arg0: i32, %arg1: i32) -> (i32, i32, i32) {
    %c0_i32 = arith.constant 0 : i32
    %c0_i32_0 = arith.constant 0 : i32
    %c0_i32_1 = arith.constant 0 : i32
    return %arg0, %c0_i32, %c0_i32_0 : i32, i32, i32
  }
}

</mosaic_0001>

<bundles_post_ra>
// kernel: tpu_custom_call.1
= control target key start
LH: loop header
LB: loop body
LE: loop exit
PB: predicated region body
PF: predicated region fallthrough
CT: control target
= control target key end

     0   :  { %12 = vsyncpa [#allocation5], 0  ;;  %s810_s0 = inlined_call_operand.hbm [shape: f32[128,768], index: 0, kind: input, shape index: {}]   ;;  %s811_s1 = inlined_call_operand.hbm [shape: f32[4,128], index: 1, kind: input, shape index: {}]   ;;  %s812_s2 = inlined_call_operand.hbm [shape: f32[4,128], index: 2, kind: input, shape index: {}]   ;;  %s813_s3 = inlined_call_operand.vmem [shape: s32[1,128], index: 3, kind: input, shape index: {}]   ;;  %s814_s4 = inlined_call_operand.vmem [shape: f32[1,768], index: 4, kind: input, shape index: {}]   ;;  %s815_s5 = inlined_call_operand.<no memory space> [shape: f32[1,1], index: 5, kind: input, shape index: {}]   ;;  %s816_s6 = inlined_call_operand.hbm [shape: f32[1,1,1], index: 6, kind: output, shape index: {}]  }
   0x1   :  { %13 = vsyncpa [#allocation8], 0 }
   0x2   :  { %14 = vsyncpa [#allocation6], 0  ;;  %s710_s21 = smov [#allocation7]   ;;  %s711_s23 = smov [#allocation4]  }
   0x3   :  { %s41_s22 = sshll.u32 %s710_s21, 4  ;;  %s25_s24 = sshll.u32 %s711_s23, 4  ;;  %s42_s22 = int_to_ptr.vmem [resolvable:$true] %s41_s22  ;;  %s26_s24 = int_to_ptr.vmem [resolvable:$true] %s25_s24 }
   0x4   :  { %s632_s25 = scalar_lea.vmem %s42_s22, 64  ;;  %p637_p1 = scmp.lt.s32.totalorder %s42_s22, %s42_s22 }
   0x5   :  { %p633_p0 = scmp.ne.s32.totalorder %s42_s22, %s632_s25  ;;  %p638_p2 = scmp.lt.s32.totalorder %s632_s25, %s632_s25 }
   0x7   :  { %p639_p3 = por %p638_p2, %p637_p1 }
   0x9   :  { %p640_p4 = pnand %p639_p3, %p633_p0 }
   0xb   :  { %643 = shalt.err (!%p640_p4)
}
   0xc   :  { %44 = dma.hbm_to_vmem [thread:$0]  %s811_s1, 64, %s42_s22, [#allocation8]  }
   0xd   :  { %s652_s28 = scalar_lea.vmem %s26_s24, 12288  ;;  %p657_p6 = scmp.lt.s32.totalorder %s26_s24, %s26_s24 }
   0xe   :  { %p653_p5 = scmp.ne.s32.totalorder %s26_s24, %s652_s28  ;;  %p658_p7 = scmp.lt.s32.totalorder %s652_s28, %s652_s28 }
  0x10   :  { %p659_p8 = por %p658_p7, %p657_p6 }
  0x12   :  { %p660_p9 = pnand %p659_p8, %p653_p5 }
  0x14   :  { %663 = shalt.err (!%p660_p9)
}
  0x15   :  { %s712_s29 = smov 768   ;;  %s713_s30 = smov 48  }
  0x16   :  { %31 = dma.hbm_to_vmem [thread:$0]  %s810_s0, 12288, %s26_s24, [#allocation5], %s712_s29, %s712_s29, %s713_s30  }
  0x17   :  { %s714_s9 = smov [#allocation9]  }
  0x18   :  { %s54_s10 = sshll.u32 %s714_s9, 4  ;;  %s55_s10 = int_to_ptr.vmem [resolvable:$true] %s54_s10 }
  0x19   :  { %s672_s11 = scalar_lea.vmem %s55_s10, 64  ;;  %p677_p11 = scmp.lt.s32.totalorder %s55_s10, %s55_s10 }
  0x1a   :  { %p673_p10 = scmp.ne.s32.totalorder %s55_s10, %s672_s11  ;;  %p678_p12 = scmp.lt.s32.totalorder %s672_s11, %s672_s11 }
  0x1c   :  { %p679_p13 = por %p678_p12, %p677_p11 }
  0x1e   :  { %p680_p0 = pnand %p679_p13, %p673_p10 }
  0x20   :  { %683 = shalt.err (!%p680_p0)
}
  0x21   :  { %57 = dma.hbm_to_vmem [thread:$0]  %s812_s2, 64, %s55_s10, [#allocation8]  }
  0x22   :  { %704 = dma.done.wait [#allocation5], 12288  }
  0x23   :  { %705 = vsyncadd [#allocation5], 4294955008 }
  0x24   :  { %706 = dma.done.wait [#allocation8], 128  }
  0x25   :  { %707 = vsyncadd [#allocation8], 4294967168  ;;  %v188_v0 = vld [vmem:[#allocation4 + $0x2d8] sm:$0xff]  ;;  %v187_v1 = vld [vmem:[#allocation4 + $0x2d0] sm:$0xff]  ;;  %v200_v14 = vlaneseq  ;;  %vm455_vm0 = vcmask 1043456   ;;  %vm95_vm1 = vcmask 0  }
  0x26   :  { %v190_v2 = vld [vmem:[#allocation4 + $0x2e8] sm:$0xff]  ;;  %230 = vmatprep.subr.mxu0 %v188_v0  ;;  %v189_v4 = vld [vmem:[#allocation4 + $0x2e0] sm:$0xff]  ;;  %v184_v5 = vld [vmem:[#allocation4 + $0x2b8] sm:$0xff] }
  0x27   :  { %300 = vmatprep.subr.mxu1 %v190_v2  ;;  %v182_v3 = vld [vmem:[#allocation4 + $0x2a8] sm:$0xff]  ;;  %231 = vmatpush1.xpose.msra.mxu0 %v187_v1  ;;  %v181_v6 = vld [vmem:[#allocation4 + $0x2a0] sm:$0xff]  ;;  %v183_v7 = vld [vmem:[#allocation4 + $0x2b0] sm:$0xff]  ;;  %v762_v19 = vshrl.u32 %v200_v14, 7 }
  0x28   :  { %301 = vmatpush1.xpose.msra.mxu1 %v189_v4  ;;  %232 = vmatprep.subr.mxu0 %v182_v3  ;;  %v176_v8 = vld [vmem:[#allocation4 + $0x278] sm:$0xff]  ;;  %v178_v9 = vld [vmem:[#allocation4 + $0x288] sm:$0xff]  ;;  %v175_v10 = vld [vmem:[#allocation4 + $0x270] sm:$0xff] }
  0x29   :  { %302 = vmatprep.subr.mxu1 %v184_v5  ;;  %v177_v11 = vld [vmem:[#allocation4 + $0x280] sm:$0xff]  ;;  %v170_v12 = vld [vmem:[#allocation4 + $0x248] sm:$0xff]  ;;  %v172_v13 = vld [vmem:[#allocation4 + $0x258] sm:$0xff]  ;;  %v206_v24 = vsub.s32 1, %v762_v19  ;;  %v214_v25 = vsub.s32 3, %v762_v19  ;;  %v202_v5 = vsub.s32 0, %v762_v19 }
  0x2a   :  { %v169_v15 = vld [vmem:[#allocation4 + $0x240] sm:$0xff]  ;;  %v171_v16 = vld [vmem:[#allocation4 + $0x250] sm:$0xff]  ;;  %v164_v17 = vld [vmem:[#allocation4 + $0x218] sm:$0xff] }
  0x2b   :  { %233 = vmatpush1.xpose.msra.mxu0 %v181_v6  ;;  %v166_v18 = vld [vmem:[#allocation4 + $0x228] sm:$0xff]  ;;  %v163_v20 = vld [vmem:[#allocation4 + $0x210] sm:$0xff]  ;;  %v165_v21 = vld [vmem:[#allocation4 + $0x220] sm:$0xff]  ;;  %v210_v6 = vsub.s32 2, %v762_v19 }
  0x2c   :  { %303 = vmatpush1.xpose.msra.mxu1 %v183_v7  ;;  %234 = vmatprep.subr.mxu0 %v176_v8  ;;  %v158_v22 = vld [vmem:[#allocation4 + $0x1e8] sm:$0xff]  ;;  %v160_v23 = vld [vmem:[#allocation4 + $0x1f8] sm:$0xff]  ;;  %v157_v26 = vld [vmem:[#allocation4 + $0x1e0] sm:$0xff]  ;;  %v222_v7 = vsub.s32 5, %v762_v19 }
  0x2d   :  { %304 = vmatprep.subr.mxu1 %v178_v9  ;;  %v159_v27 = vld [vmem:[#allocation4 + $0x1f0] sm:$0xff]  ;;  %v152_v28 = vld [vmem:[#allocation4 + $0x1b8] sm:$0xff]  ;;  %v154_v29 = vld [vmem:[#allocation4 + $0x1c8] sm:$0xff] }
  0x2e   :  { %v769_v30 = vld [vmem:[%s814_s4] sm:$0x3f]  ;;  %v151_v33 = vld [vmem:[#allocation4 + $0x1b0] sm:$0xff]  ;;  %v146_v35 = vld [vmem:[#allocation4 + $0x188] sm:$0xff] }
  0x2f   :  { %235 = vmatpush1.xpose.msra.mxu0 %v175_v10  ;;  %v207_v31 = vrot.slane %v769_v30, %v206_v24  ;;  %v215_v32 = vrot.slane %v769_v30, %v214_v25  ;;  %v153_v34 = vld [vmem:[#allocation4 + $0x1c0] sm:$0xff]  ;;  %v148_v36 = vld [vmem:[#allocation4 + $0x198] sm:$0xff]  ;;  %v147_v38 = vld [vmem:[#allocation4 + $0x190] sm:$0xff] }
  0x30   :  { %305 = vmatpush1.xpose.msra.mxu1 %v177_v11  ;;  %236 = vmatprep.subr.mxu0 %v170_v12  ;;  %v145_v37 = vld [vmem:[#allocation4 + $0x180] sm:$0xff]  ;;  %v140_v39 = vld [vmem:[#allocation4 + $0x158] sm:$0xff]  ;;  %v142_v40 = vld [vmem:[#allocation4 + $0x168] sm:$0xff]  ;;  %v203_v11 = vrot.slane %v769_v30, %v202_v5  ;;  %v211_v12 = vrot.slane %v769_v30, %v210_v6 }
  0x31   :  { %306 = vmatprep.subr.mxu1 %v172_v13  ;;  %294 = vmatprep.mubr.f32.mxu0 %v207_v31  ;;  %v139_v41 = vld [vmem:[#allocation4 + $0x150] sm:$0xff]  ;;  %v141_v42 = vld [vmem:[#allocation4 + $0x160] sm:$0xff]  ;;  %v134_v43 = vld [vmem:[#allocation4 + $0x128] sm:$0xff]  ;;  %v223_v13 = vrot.slane %v769_v30, %v222_v7 }
  0x32   :  { %364 = vmatprep.mubr.f32.mxu1 %v215_v32  ;;  %v136_v44 = vld [vmem:[#allocation4 + $0x138] sm:$0xff]  ;;  %v133_v45 = vld [vmem:[#allocation4 + $0x120] sm:$0xff]  ;;  %v135_v46 = vld [vmem:[#allocation4 + $0x130] sm:$0xff] }
  0x33   :  { %237 = vmatpush1.xpose.msra.mxu0 %v169_v15  ;;  %v128_v47 = vld [vmem:[#allocation4 + $0xf8] sm:$0xff]  ;;  %v130_v48 = vld [vmem:[#allocation4 + $0x108] sm:$0xff]  ;;  %v127_v49 = vld [vmem:[#allocation4 + $0xf0] sm:$0xff] }
  0x34   :  { %307 = vmatpush1.xpose.msra.mxu1 %v171_v16  ;;  %238 = vmatprep.subr.mxu0 %v164_v17  ;;  %v129_v50 = vld [vmem:[#allocation4 + $0x100] sm:$0xff]  ;;  %v122_v51 = vld [vmem:[#allocation4 + $0xc8] sm:$0xff]  ;;  %v124_v52 = vld [vmem:[#allocation4 + $0xd8] sm:$0xff] }
  0x35   :  { %308 = vmatprep.subr.mxu1 %v166_v18  ;;  %v121_v53 = vld [vmem:[#allocation4 + $0xc0] sm:$0xff]  ;;  %v123_v54 = vld [vmem:[#allocation4 + $0xd0] sm:$0xff]  ;;  %v116_v55 = vld [vmem:[#allocation4 + $0x98] sm:$0xff] }
  0x36   :  { %v118_v56 = vld [vmem:[#allocation4 + $0xa8] sm:$0xff]  ;;  %v115_v57 = vld [vmem:[#allocation4 + $0x90] sm:$0xff]  ;;  %v117_v58 = vld [vmem:[#allocation4 + $0xa0] sm:$0xff] }
  0x37   :  { %239 = vmatpush1.xpose.msra.mxu0 %v163_v20  ;;  %v110_v59 = vld [vmem:[#allocation4 + $0x68] sm:$0xff]  ;;  %v112_v60 = vld [vmem:[#allocation4 + $0x78] sm:$0xff]  ;;  %v109_v61 = vld [vmem:[#allocation4 + $0x60] sm:$0xff] }
  0x38   :  { %309 = vmatpush1.xpose.msra.mxu1 %v165_v21  ;;  %240 = vmatprep.subr.mxu0 %v158_v22  ;;  %v111_v62 = vld [vmem:[#allocation4 + $0x70] sm:$0xff]  ;;  %v104_v63 = vld [vmem:[#allocation4 + $0x38] sm:$0xff]  ;;  %v106_v0 = vld [vmem:[#allocation4 + $0x48] sm:$0xff] }
  0x39   :  { %310 = vmatprep.subr.mxu1 %v160_v23  ;;  %v103_v1 = vld [vmem:[#allocation4 + $0x30] sm:$0xff]  ;;  %v105_v2 = vld [vmem:[#allocation4 + $0x40] sm:$0xff]  ;;  %v98_v3 = vld [vmem:[#allocation4 + $0x8] sm:$0xff] }
  0x3a   :  { %v100_v4 = vld [vmem:[#allocation4 + $0x18] sm:$0xff]  ;;  %v97_v8 = vld [vmem:[#allocation4] sm:$0xff]  ;;  %v99_v9 = vld [vmem:[#allocation4 + $0x10] sm:$0xff] }
  0x3b   :  { %241 = vmatpush1.xpose.msra.mxu0 %v157_v26  ;;  %v192_v10 = vld [vmem:[#allocation4 + $0x2f8] sm:$0xff]  ;;  %v191_v15 = vld [vmem:[#allocation4 + $0x2f0] sm:$0xff]  ;;  %v186_v16 = vld [vmem:[#allocation4 + $0x2c8] sm:$0xff] }
  0x3c   :  { %311 = vmatpush1.xpose.msra.mxu1 %v159_v27  ;;  %242 = vmatprep.subr.mxu0 %v152_v28  ;;  %v185_v17 = vld [vmem:[#allocation4 + $0x2c0] sm:$0xff]  ;;  %v180_v18 = vld [vmem:[#allocation4 + $0x298] sm:$0xff]  ;;  %v179_v20 = vld [vmem:[#allocation4 + $0x290] sm:$0xff] }
  0x3d   :  { %312 = vmatprep.subr.mxu1 %v154_v29  ;;  %v174_v21 = vld [vmem:[#allocation4 + $0x268] sm:$0xff]  ;;  %v173_v22 = vld [vmem:[#allocation4 + $0x260] sm:$0xff]  ;;  %v168_v23 = vld [vmem:[#allocation4 + $0x238] sm:$0xff] }
  0x3e   :  { %v167_v24 = vld [vmem:[#allocation4 + $0x230] sm:$0xff]  ;;  %v162_v25 = vld [vmem:[#allocation4 + $0x208] sm:$0xff]  ;;  %v161_v26 = vld [vmem:[#allocation4 + $0x200] sm:$0xff] }
  0x3f   :  { %243 = vmatpush1.xpose.msra.mxu0 %v151_v33  ;;  %v156_v27 = vld [vmem:[#allocation4 + $0x1d8] sm:$0xff]  ;;  %v155_v28 = vld [vmem:[#allocation4 + $0x1d0] sm:$0xff]  ;;  %v150_v29 = vld [vmem:[#allocation4 + $0x1a8] sm:$0xff] }
  0x40   :  { %313 = vmatpush1.xpose.msra.mxu1 %v153_v34  ;;  %244 = vmatprep.subr.mxu0 %v146_v35  ;;  %v149_v31 = vld [vmem:[#allocation4 + $0x1a0] sm:$0xff]  ;;  %v144_v32 = vld [vmem:[#allocation4 + $0x178] sm:$0xff]  ;;  %v143_v33 = vld [vmem:[#allocation4 + $0x170] sm:$0xff] }
  0x41   :  { %314 = vmatprep.subr.mxu1 %v148_v36  ;;  %v138_v34 = vld [vmem:[#allocation4 + $0x148] sm:$0xff]  ;;  %v137_v35 = vld [vmem:[#allocation4 + $0x140] sm:$0xff]  ;;  %v132_v36 = vld [vmem:[#allocation4 + $0x118] sm:$0xff] }
  0x43   :  { %245 = vmatpush1.xpose.msra.mxu0 %v145_v37  ;;  %v131_v37 = vld [vmem:[#allocation4 + $0x110] sm:$0xff] }
  0x44   :  { %315 = vmatpush1.xpose.msra.mxu1 %v147_v38  ;;  %246 = vmatprep.subr.mxu0 %v140_v39  ;;  %v126_v38 = vld [vmem:[#allocation4 + $0xe8] sm:$0xff]  ;;  %v125_v39 = vld [vmem:[#allocation4 + $0xe0] sm:$0xff] }
  0x45   :  { %316 = vmatprep.subr.mxu1 %v142_v40  ;;  %v120_v40 = vld [vmem:[#allocation4 + $0xb8] sm:$0xff] }
  0x47   :  { %247 = vmatpush1.xpose.msra.mxu0 %v139_v41  ;;  %v119_v41 = vld [vmem:[#allocation4 + $0xb0] sm:$0xff] }
  0x48   :  { %317 = vmatpush1.xpose.msra.mxu1 %v141_v42  ;;  %248 = vmatprep.subr.mxu0 %v134_v43  ;;  %v114_v42 = vld [vmem:[#allocation4 + $0x88] sm:$0xff]  ;;  %v113_v43 = vld [vmem:[#allocation4 + $0x80] sm:$0xff] }
  0x49   :  { %318 = vmatprep.subr.mxu1 %v136_v44  ;;  %v108_v44 = vld [vmem:[#allocation4 + $0x58] sm:$0xff] }
  0x4b   :  { %249 = vmatpush1.xpose.msra.mxu0 %v133_v45  ;;  %v107_v45 = vld [vmem:[#allocation4 + $0x50] sm:$0xff] }
  0x4c   :  { %319 = vmatpush1.xpose.msra.mxu1 %v135_v46  ;;  %250 = vmatprep.subr.mxu0 %v128_v47  ;;  %v102_v46 = vld [vmem:[#allocation4 + $0x28] sm:$0xff]  ;;  %v218_v47 = vsub.s32 4, %v762_v19 }
  0x4d   :  { %320 = vmatprep.subr.mxu1 %v130_v48  ;;  %v101_v48 = vld [vmem:[#allocation4 + $0x20] sm:$0xff] }
  0x4f   :  { %251 = vmatpush1.xpose.msra.mxu0 %v127_v49  ;;  %v219_v49 = vrot.slane %v769_v30, %v218_v47  ;;  %v198_v30 = vstv %s815_s5 }
  0x50   :  { %321 = vmatpush1.xpose.msra.mxu1 %v129_v50  ;;  %252 = vmatprep.subr.mxu0 %v122_v51 }
  0x51   :  { %322 = vmatprep.subr.mxu1 %v124_v52 }
  0x53   :  { %253 = vmatpush1.xpose.msra.mxu0 %v121_v53 }
  0x54   :  { %323 = vmatpush1.xpose.msra.mxu1 %v123_v54  ;;  %254 = vmatprep.subr.mxu0 %v116_v55  ;;  %v193_v54 = vld [vmem:[#allocation7] sm:$0xf] }
  0x55   :  { %324 = vmatprep.subr.mxu1 %v118_v56  ;;  %v456_v55 = vsel %vm455_vm0, %v193_v54, -inf }
  0x56   :  { %v457_v56 = vrot.slane %v456_v55, 4 }
  0x57   :  { %255 = vmatpush1.xpose.msra.mxu0 %v115_v57 }
  0x58   :  { %325 = vmatpush1.xpose.msra.mxu1 %v117_v58  ;;  %256 = vmatprep.subr.mxu0 %v110_v59  ;;  %v458_v57 = vmax.f32 %v456_v55, %v457_v56 }
  0x59   :  { %326 = vmatprep.subr.mxu1 %v112_v60 }
  0x5a   :  { %v459_v58 = vrot.slane %v458_v57, 2 }
  0x5b   :  { %257 = vmatpush1.xpose.msra.mxu0 %v109_v61 }
  0x5c   :  { %327 = vmatpush1.xpose.msra.mxu1 %v111_v62  ;;  %258 = vmatprep.subr.mxu0 %v104_v63  ;;  %v460_v59 = vmax.f32 %v458_v57, %v459_v58 }
  0x5d   :  { %328 = vmatprep.subr.mxu1 %v106_v0 }
  0x5e   :  { %v461_v60 = vrot.slane %v460_v59, 1 }
  0x5f   :  { %259 = vmatpush1.xpose.msra.mxu0 %v103_v1 }
  0x60   :  { %329 = vmatpush1.xpose.msra.mxu1 %v105_v2  ;;  %260 = vmatprep.subr.mxu0 %v98_v3  ;;  %v462_v61 = vmax.f32 %v460_v59, %v461_v60 }
  0x61   :  { %330 = vmatprep.subr.mxu1 %v100_v4 }
  0x62   :  { %v463_v62 = vsub.f32 %v193_v54, %v462_v61 }
  0x63   :  { %261 = vmatpush1.xpose.msra.mxu0 %v97_v8 }
  0x64   :  { %331 = vmatpush1.xpose.msra.mxu1 %v99_v9  ;;  %370 = vmatprep.subr.mxu0 %v192_v10  ;;  %v464_v63 = vmul.f32 1.442695, %v463_v62 }
  0x66   :  { %295 = vmatmul.mubr.f32.vlgmr.msra.gmra.mxu0 %v203_v11  ;;  %604 = vpow2.f32 %v464_v63 }
  0x67   :  { %365 = vmatmul.mubr.f32.vlgmr.msra.gmra.mxu1 %v211_v12  ;;  %371 = vmatpush1.xpose.msra.mxu0 %v191_v15 }
  0x68   :  { %434 = vmatprep.mubr.f32.mxu0 %v223_v13  ;;  %372 = vmatprep.subr.mxu0 %v186_v16 }
  0x6b   :  { %373 = vmatpush1.xpose.msra.mxu0 %v185_v17 }
  0x6c   :  { %374 = vmatprep.subr.mxu0 %v180_v18  ;;  %v715_v18 = vmov 0.0  }
  0x6d   :  { %96 = vst.msk [vmem:[#allocation2] sm:$0x1] %vm95_vm1, %v715_v18 }
  0x6f   :  { %375 = vmatpush1.xpose.msra.mxu0 %v179_v20 }
  0x70   :  { %376 = vmatprep.subr.mxu0 %v174_v21  ;;  %v194_v21 = vld [vmem:[#allocation9] sm:$0xf] }
  0x73   :  { %377 = vmatpush1.xpose.msra.mxu0 %v173_v22  ;;  %v605_v0 = vpop.eup %604 }
  0x74   :  { %378 = vmatprep.subr.mxu0 %v168_v23  ;;  %v466_v2 = vsel %vm455_vm0, %v605_v0, 0.0 }
  0x75   :  { %v467_v6 = vrot.slane %v466_v2, 4 }
  0x77   :  { %379 = vmatpush1.xpose.msra.mxu0 %v167_v24  ;;  %v468_v10 = vadd.f32 %v467_v6, %v466_v2 }
  0x78   :  { %380 = vmatprep.subr.mxu0 %v162_v25 }
  0x79   :  { %v469_v13 = vrot.slane %v468_v10, 2 }
  0x7b   :  { %381 = vmatpush1.xpose.msra.mxu0 %v161_v26  ;;  %v470_v15 = vadd.f32 %v469_v13, %v468_v10  ;;  %v594_v10 = vld [vmem:[%s813_s3] ss:$0 sm:$0xff]  ;;  %s716_s3 = smov [#allocation10]  }
  0x7c   :  { %382 = vmatprep.subr.mxu0 %v156_v27  ;;  %vm540_vm3 = vcmp.eq.s32.totalorder %v762_v19, %v594_v10  ;;  %s581_s15 = sshll.u32 %s716_s3, 4  ;;  %s582_s15 = int_to_ptr.vmem [resolvable:$true] %s581_s15 }
  0x7d   :  { %v471_v16 = vrot.slane %v470_v15, 1  ;;  %s684_s16 = scalar_lea.vmem %s582_s15, 16  ;;  %s688_s17 = scalar_lea.vmem %s582_s15, 32 }
  0x7e   :  { %p685_p1 = scmp.ne.s32.totalorder %s582_s15, %s684_s16  ;;  %p689_p2 = scmp.lt.s32.totalorder %s582_s15, %s582_s15 }
  0x7f   :  { %383 = vmatpush1.xpose.msra.mxu0 %v155_v28  ;;  %v472_v17 = vadd.f32 %v471_v16, %v470_v15  ;;  %p690_p3 = scmp.lt.s32.totalorder %s688_s17, %s684_s16 }
  0x80   :  { %384 = vmatprep.subr.mxu0 %v150_v29 }
  0x81   :  { %p691_p4 = por %p690_p3, %p689_p2 }
  0x83   :  { %385 = vmatpush1.xpose.msra.mxu0 %v149_v31  ;;  %p692_p5 = pnand %p691_p4, %p685_p1 }
  0x84   :  { %386 = vmatprep.subr.mxu0 %v144_v32 }
  0x87   :  { %387 = vmatpush1.xpose.msra.mxu0 %v143_v33 }
  0x88   :  { %388 = vmatprep.subr.mxu0 %v138_v34 }
  0x8b   :  { %389 = vmatpush1.xpose.msra.mxu0 %v137_v35 }
  0x8c   :  { %390 = vmatprep.subr.mxu0 %v132_v36 }
  0x8f   :  { %391 = vmatpush1.xpose.msra.mxu0 %v131_v37 }
  0x90   :  { %392 = vmatprep.subr.mxu0 %v126_v38 }
  0x93   :  { %393 = vmatpush1.xpose.msra.mxu0 %v125_v39 }
  0x94   :  { %394 = vmatprep.subr.mxu0 %v120_v40 }
  0x97   :  { %395 = vmatpush1.xpose.msra.mxu0 %v119_v41 }
  0x98   :  { %396 = vmatprep.subr.mxu0 %v114_v42 }
  0x9b   :  { %397 = vmatpush1.xpose.msra.mxu0 %v113_v43 }
  0x9c   :  { %398 = vmatprep.subr.mxu0 %v108_v44 }
  0x9f   :  { %399 = vmatpush1.xpose.msra.mxu0 %v107_v45 }
  0xa0   :  { %400 = vmatprep.subr.mxu0 %v102_v46 }
  0xa3   :  { %401 = vmatpush1.xpose.msra.mxu0 %v101_v48 }
  0xa6   :  { %435 = vmatmul.mubr.f32.vlgmr.msra.gmra.mxu0 %v219_v49 }
 0x126   :  { %v296_v50 = vpop.f32.mrf.mxu0 }
 0x127   :  { %v366_v51 = vpop.f32.mrf.mxu1  ;;  %v297_v1 = vadd.f32 %v296_v50, %v198_v30 }
 0x128   :  { %v298_v52 = vpop.f32.mrf.mxu0 }
 0x129   :  { %v368_v53 = vpop.f32.mrf.mxu1  ;;  %v367_v3 = vadd.f32 %v366_v51, %v297_v1 }
 0x166   :  { %v436_v4 = vpop.f32.mrf.mxu0 }
 0x167   :  { %v437_v7 = vadd.f32 %v436_v4, %v367_v3 }
 0x168   :  { %v438_v8 = vpop.f32.mrf.mxu0 }
 0x169   :  { %v441_v9 = vand.u32 2147483647, %v437_v7  ;;  %v440_v32 = vmax.f32 %v437_v7, 0.0 }
 0x16b   :  { %v442_v11 = vsub.f32 0.0, %v441_v9 }
 0x16d   :  { %v443_v12 = vmul.f32 1.442695, %v442_v11 }
 0x16f   :  { %606 = vpow2.f32 %v443_v12 }
 0x170   :  { %608 = vlog2.f32 %v472_v17  ;;  %v595_v17 = vsel %vm540_vm3, 1.0, %v715_v18 }
 0x17c   :  { %v607_v20 = vpop.eup %606 }
 0x17d   :  { %v445_v22 = vadd.f32 1.0, %v607_v20  ;;  %v448_v23 = vmul.f32 -0.5, %v607_v20  ;;  %v451_v25 = vand.u32 2147483647, %v607_v20  ;;  %v609_v26 = vpop.eup %608 }
 0x17e   :  { %v474_v33 = vmul.f32 0.6931472, %v609_v26 }
 0x17f   :  { %610 = vlog2.f32 %v445_v22  ;;  %v449_v24 = vadd.f32 1.0, %v448_v23  ;;  %vm452_vm2 = vcmp.lt.f32.partialorder %v451_v25, 0.0004427343 }
 0x180   :  { %612 = vlog2.f32 %v194_v21  ;;  %v475_v38 = vsub.f32 %v463_v62, %v474_v33 }
 0x181   :  { %v450_v31 = vmul.f32 %v607_v20, %v449_v24 }
 0x18c   :  { %v611_v27 = vpop.eup %610 }
 0x18d   :  { %v613_v28 = vpop.eup %612  ;;  %v447_v29 = vmul.f32 0.6931472, %v611_v27 }
 0x18e   :  { %v477_v36 = vmul.f32 0.6931472, %v613_v28 }
 0x18f   :  { %v453_v34 = vsel %vm452_vm2, %v450_v31, %v447_v29 }
 0x190   :  { %v454_v35 = vadd.f32 %v453_v34, %v440_v32 }
 0x192   :  { %v481_v37 = vrot.slane %v454_v35, %v202_v5 }
 0x194   :  { %v482_v39 = vmul.f32 %v481_v37, %v477_v36  ;;  %v555_v36 = vand.u32 127, %v200_v14 }
 0x196   :  { %v483_v40 = vsel %vm455_vm0, %v482_v39, -inf  ;;  %v513_v41 = vadd.f32 %v482_v39, %v475_v38  ;;  %vm558_vm4 = vcmp.lt.s32.totalorder %v555_v36, 16 }
 0x197   :  { %v484_v42 = vrot.slane %v483_v40, 4 }
 0x198   :  { %v514_v43 = vsel %vm455_vm0, %v513_v41, -inf }
 0x199   :  { %v485_v44 = vmax.f32 %v483_v40, %v484_v42  ;;  %v515_v45 = vrot.slane %v514_v43, 4  ;;  %v596_v42 = vsel %vm558_vm4, 1.0, %v715_v18 }
 0x19b   :  { %v486_v46 = vrot.slane %v485_v44, 2  ;;  %v516_v47 = vmax.f32 %v514_v43, %v515_v45  ;;  %v564_v45 = vld [vmem:[#allocation2] sm:$0x1] }
 0x19d   :  { %v487_v48 = vmax.f32 %v485_v44, %v486_v46  ;;  %v517_v49 = vrot.slane %v516_v47, 2 }
 0x19f   :  { %v488_v50 = vrot.slane %v487_v48, 1  ;;  %v518_v51 = vmax.f32 %v516_v47, %v517_v49 }
 0x1a1   :  { %v489_v52 = vmax.f32 %v487_v48, %v488_v50  ;;  %v519_v53 = vrot.slane %v518_v51, 1 }
 0x1a3   :  { %v490_v54 = vsub.f32 %v482_v39, %v489_v52  ;;  %v520_v5 = vmax.f32 %v518_v51, %v519_v53 }
 0x1a5   :  { %v491_v55 = vmul.f32 1.442695, %v490_v54  ;;  %v521_v56 = vsub.f32 %v513_v41, %v520_v5 }
 0x1a7   :  { %614 = vpow2.f32 %v491_v55  ;;  %v522_v57 = vmul.f32 1.442695, %v521_v56 }
 0x1a9   :  { %616 = vpow2.f32 %v522_v57 }
 0x1b4   :  { %v615_v58 = vpop.eup %614 }
 0x1b5   :  { %v493_v59 = vsel %vm455_vm0, %v615_v58, 0.0 }
 0x1b6   :  { %v617_v60 = vpop.eup %616  ;;  %v494_v61 = vrot.slane %v493_v59, 4 }
 0x1b7   :  { %v524_v62 = vsel %vm455_vm0, %v617_v60, 0.0 }
 0x1b8   :  { %v495_v63 = vadd.f32 %v494_v61, %v493_v59  ;;  %v525_v30 = vrot.slane %v524_v62, 4 }
 0x1ba   :  { %v496_v0 = vrot.slane %v495_v63, 2  ;;  %v526_v1 = vadd.f32 %v525_v30, %v524_v62 }
 0x1bc   :  { %v497_v2 = vadd.f32 %v496_v0, %v495_v63  ;;  %v527_v3 = vrot.slane %v526_v1, 2 }
 0x1be   :  { %v498_v4 = vrot.slane %v497_v2, 1  ;;  %v528_v6 = vadd.f32 %v527_v3, %v526_v1 }
 0x1c0   :  { %v499_v7 = vadd.f32 %v498_v4, %v497_v2  ;;  %v529_v8 = vrot.slane %v528_v6, 1 }
 0x1c2   :  { %618 = vrcp.f32 %v499_v7  ;;  %v530_v9 = vadd.f32 %v529_v8, %v528_v6 }
 0x1c4   :  { %620 = vlog2.f32 %v530_v9 }
 0x1cf   :  { %v619_v11 = vpop.eup %618 }
 0x1d0   :  { %v501_v12 = vmul.f32 %v619_v11, %v615_v58 }
 0x1d1   :  { %v621_v13 = vpop.eup %620 }
 0x1d2   :  { %v502_v15 = vmul.f32 1.442695, %v501_v12  ;;  %v532_v16 = vmul.f32 0.6931472, %v621_v13 }
 0x1d4   :  { %622 = vpow2.f32 %v502_v15  ;;  %v533_v20 = vsub.f32 %v521_v56, %v532_v16 }
 0x1d6   :  { %v543_v21 = vmul.f32 %v595_v17, %v533_v20 }
 0x1d8   :  { %v544_v22 = vsel %vm455_vm0, %v543_v21, 0.0 }
 0x1d9   :  { %v545_v23 = vrot.slane %v544_v22, 4 }
 0x1db   :  { %v546_v24 = vadd.f32 %v545_v23, %v544_v22 }
 0x1dd   :  { %v547_v27 = vrot.slane %v546_v24, 2 }
 0x1df   :  { %v548_v19 = vadd.f32 %v547_v27, %v546_v24 }
 0x1e1   :  { %v623_v25 = vpop.eup %622  ;;  %v549_v34 = vrot.slane %v548_v19, 1 }
 0x1e2   :  { %v504_v26 = vmul.f32 %v623_v25, %v501_v12 }
 0x1e3   :  { %v550_v38 = vadd.f32 %v549_v34, %v548_v19 }
 0x1e4   :  { %v505_v28 = vsel %vm455_vm0, %v504_v26, 0.0 }
 0x1e5   :  { %v506_v29 = vrot.slane %v505_v28, 4  ;;  %v551_v40 = vsub.f32 0.0, %v550_v38 }
 0x1e7   :  { %v507_v31 = vadd.f32 %v506_v29, %v505_v28 }
 0x1e9   :  { %v508_v32 = vrot.slane %v507_v31, 2 }
 0x1eb   :  { %v509_v33 = vadd.f32 %v508_v32, %v507_v31 }
 0x1ed   :  { %v510_v35 = vrot.slane %v509_v33, 1 }
 0x1ef   :  { %v511_v37 = vadd.f32 %v510_v35, %v509_v33 }
 0x1f1   :  { %v512_v39 = vsub.f32 0.0, %v511_v37 }
 0x1f3   :  { %v561_v41 = vmul.f32 0.03, %v512_v39 }
 0x1f5   :  { %v562_v43 = vadd.f32 %v561_v41, %v551_v40 }
 0x1f7   :  { %v563_v44 = vmul.f32 %v596_v42, %v562_v43 }
 0x1f9   :  { %565 = vadd.xlane.f32.xlu0 %v563_v44 }
 0x282   :  { %v566_v46 = vpop.xlane.xlu0 %565 }
 0x283   :  { %v567_v47 = vadd.f32 %v566_v46, %v564_v45 }
 0x285   :  { %569 = vst.msk [vmem:[#allocation2] sm:$0x1] %vm95_vm1, %v567_v47 }
 0x28c   :  { %v573_v14 = vld [vmem:[#allocation2] sm:$0x1] }
 0x28d   :  { %574 = vst.msk [vmem:[#allocation10] sm:$0x1] %vm95_vm1, %v573_v14 }
 0x28e   :  { %695 = shalt.err (!%p692_p5)
}
 0x28f   :  { %584 = dma.vmem_to_hbm [thread:$0]  %s582_s15, 16, %s816_s6, [#allocation6]  }
 0x290   :  { %708 = dma.done.wait [#allocation6], 16  }
 0x291   :  { %709 = vsyncadd [#allocation6], 4294967280 }
 0x292   :  { %588 = vsyncpa [#allocation5], 1 }
 0x293   :  { %589 = vsyncpa [#allocation8], 1 }
 0x294   :  { %590 = vsyncpa [#allocation6], 1 }

</bundles_post_ra>
